<compile_context>
chip_gen: v6e
topology: v6e:2x2x1
jax: 0.10.0
libtpu: 0.0.40
codegen_flags: <defaults>
</compile_context>

<pallas_src>
import functools

import jax
import jax.numpy as jnp
from jax.experimental import pallas as pl
from jax.experimental.pallas import tpu as pltpu


# -----------------------------------------------------------------------------
# Fused kernel (one batch row per grid step):
#   AvgPool1d -> grouped 1x1 conv -> softmax(K)        (get_weight branch)
#   depthwise conv(K) -> BN(eval) -> ReLU              (generate_feature branch)
#   weighted = feature * softmax
#   inner    = Conv1d(C, OUT, K, stride=K) over interleaved (l k) axis
#            = per-position contraction over (c, k)
#   out      = x + inner                               (Residual)
# -----------------------------------------------------------------------------
def _residual_rfa_kernel(xp_ref, w1_ref, w2_ref, bns_ref, bnb_ref, wf_ref,
                         b_ref, out_ref):
    xp = xp_ref[0]                       # (C, Lp)  zero-padded input, one batch
    w1 = w1_ref[...]                     # (C, K)   grouped 1x1 conv weight
    w2 = w2_ref[...]                     # (C, K, K) depthwise conv weight
    bns = bns_ref[...]                   # (C, K)   BN scale (eval, folded)
    bnb = bnb_ref[...]                   # (C, K)   BN shift (eval, folded)
    wf = wf_ref[...]                     # (OUT, C*K)  final conv weight, [o, c*K+k]
    bias = b_ref[...]                    # (OUT, 1)

    C, Lp = xp.shape
    K = w1.shape[1]
    pad = K // 2
    L = Lp - 2 * pad
    OUT = wf.shape[0]

    # --- AvgPool1d(kernel=K, stride=1, pad=K//2, count_include_pad=True) ---
    pooled = xp[:, 0:L]
    for j in range(1, K):
        pooled = pooled + xp[:, j:j + L]
    pooled = pooled * (1.0 / K)                                   # (C, L)

    # --- get_weight: grouped 1x1 conv then softmax over the K axis ---
    logits = w1[:, :, None] * pooled[:, None, :]                  # (C, K, L)
    m = jnp.max(logits, axis=1, keepdims=True)
    e = jnp.exp(logits - m)
    denom = jnp.sum(e, axis=1, keepdims=True)
    sm = e * pl.reciprocal(denom, approx=True)                    # EUP, not VALU divide

    # --- generate_feature: depthwise conv (kernel=K, pad=K//2, groups=C) ---
    feat = w2[:, :, 0][:, :, None] * xp[:, None, 0:L]
    for mm in range(1, K):
        feat = feat + w2[:, :, mm][:, :, None] * xp[:, None, mm:mm + L]

    # --- BatchNorm1d (eval mode, folded to scale/shift) + ReLU ---
    feat = feat * bns[:, :, None] + bnb[:, :, None]
    feat = jnp.maximum(feat, 0.0)

    # --- weighted_data = feature * softmax(weight) ---
    weighted = feat * sm                                          # (C, K, L)

    # --- fused final Conv1d(C, OUT, K, stride=K) over interleaved (l k) axis:
    #     inner[o, l] = bias[o] + sum_{c,k} wf[o, c*K+k] * weighted[c, k, l]
    #     C*K and OUT are tiny -> VPU broadcast-FMA; no MXU, no HBM intermediate.
    acc = None
    for c in range(C):
        w_rows = weighted[c]                                      # (K, L)
        for k in range(K):
            col = wf[:, c * K + k:c * K + k + 1]                  # (OUT, 1)
            term = col * w_rows[k:k + 1, :]                       # (OUT, L)
            acc = term if acc is None else acc + term
    inner = acc + bias                                            # (OUT, L)

    # --- Residual: out = x + module(x)   (OUT == C) ---
    out_ref[0] = xp[:, pad:pad + L] + inner


def residual_forward(x, params, kernel_size):
    """Residual(RFAConv1D-style block). x: (B, C, L) f32 -> (B, C, L) f32."""
    B, C, L = x.shape
    K = kernel_size
    pad = K // 2
    Lp = L + 2 * pad

    w1 = params["w1"]               # (C, K)
    w2 = params["w2"]               # (C, K, K)
    bn_scale = params["bn_scale"]   # (C, K)
    bn_shift = params["bn_shift"]   # (C, K)
    wf = params["wf"]               # (OUT, C, K)
    bias = params["bias"]           # (OUT,)
    OUT = wf.shape[0]
    assert OUT == C, "Residual needs module out_channels == in_channels"

    # Zero-pad the spatial axis (input-only glue; the big intermediates never
    # leave VMEM).  Tiny weight reshapes are layout glue as well.
    x_pad = jnp.pad(x, ((0, 0), (0, 0), (pad, pad)))
    wf_mat = wf.reshape(OUT, C * K)
    bias2d = bias.reshape(OUT, 1)

    return pl.pallas_call(
        _residual_rfa_kernel,
        out_shape=jax.ShapeDtypeStruct((B, C, L), jnp.float32),
        grid_spec=pltpu.PrefetchScalarGridSpec(
            num_scalar_prefetch=0,
            grid=(B,),
            in_specs=[
                pl.BlockSpec((1, C, Lp), lambda b: (b, 0, 0)),
                pl.BlockSpec((C, K), lambda b: (0, 0)),
                pl.BlockSpec((C, K, K), lambda b: (0, 0, 0)),
                pl.BlockSpec((C, K), lambda b: (0, 0)),
                pl.BlockSpec((C, K), lambda b: (0, 0)),
                pl.BlockSpec((OUT, C * K), lambda b: (0, 0)),
                pl.BlockSpec((OUT, 1), lambda b: (0, 0)),
            ],
            out_specs=pl.BlockSpec((1, C, L), lambda b: (b, 0, 0)),
        ),
        compiler_params=pltpu.CompilerParams(
            dimension_semantics=("parallel",),          # independent batch rows
            vmem_limit_bytes=32 * 1024 * 1024,          # fits v5e/v6e/v7x budgets
        ),
    )(x_pad, w1, w2, bn_scale, bn_shift, wf_mat, bias2d)


# -----------------------------------------------------------------------------
# Pure-JAX reference (mirrors the Residual(module) forward) for validation.
# -----------------------------------------------------------------------------
def residual_reference(x, params, kernel_size):
    B, C, L = x.shape
    K = kernel_size
    pad = K // 2
    w1, w2 = params["w1"], params["w2"]
    bn_scale, bn_shift = params["bn_scale"], params["bn_shift"]
    wf, bias = params["wf"], params["bias"]

    xp = jnp.pad(x, ((0, 0), (0, 0), (pad, pad)))
    pooled = sum(xp[:, :, j:j + L] for j in range(K)) / K                 # (B,C,L)
    logits = w1[None, :, :, None] * pooled[:, :, None, :]                 # (B,C,K,L)
    sm = jax.nn.softmax(logits, axis=2)
    feat = sum(
        w2[None, :, :, m, None] * xp[:, :, None, m:m + L] for m in range(K)
    )                                                                     # (B,C,K,L)
    feat = feat * bn_scale[None, :, :, None] + bn_shift[None, :, :, None]
    feat = jnp.maximum(feat, 0.0)
    weighted = feat * sm
    # stride-K conv over the interleaved '(l k)' axis == per-position (c,k) contraction
    inner = jnp.einsum("ock,bckl->bol", wf, weighted) + bias[None, :, None]
    return x + inner                                                      # Residual


def make_params(channels, kernel_size, key):
    C, K = channels, kernel_size
    OUT = C                             # residual: out_channels == in_channels
    k1, k2, k3, k4 = jax.random.split(key, 4)
    w1 = 0.5 * jax.random.normal(k1, (C, K), jnp.float32)       # Conv1d(C, C*K, 1, groups=C)
    w2 = 0.5 * jax.random.normal(k2, (C, K, K), jnp.float32)    # Conv1d(C, C*K, K, groups=C)
    wf = 0.3 * jax.random.normal(k3, (OUT, C, K), jnp.float32)  # Conv1d(C, OUT, K, stride=K)
    bias = 0.1 * jax.random.normal(k4, (OUT,), jnp.float32)

    # Deterministic BatchNorm1d(C*K) params (eval mode), folded to scale/shift.
    eps = 1e-5
    idx = jnp.arange(C * K, dtype=jnp.float32)
    gamma = 1.0 + 0.05 * idx / (C * K)
    beta = 0.02 * idx / (C * K)
    running_mean = 0.01 * idx / (C * K)
    running_var = 1.0 + 0.03 * idx / (C * K)
    scale = (gamma / jnp.sqrt(running_var + eps)).reshape(C, K)
    shift = (beta - running_mean * gamma / jnp.sqrt(running_var + eps)).reshape(C, K)

    return {"w1": w1, "w2": w2, "bn_scale": scale, "bn_shift": shift,
            "wf": wf, "bias": bias}


if __name__ == "__main__":
    B, C, L = 2, 4, 128   # L = 128 -> lane-dense output stores
    K = 3                 # odd kernel, pad = K//2, stride = 1 inside the block

    key = jax.random.PRNGKey(0)
    kx, kp = jax.random.split(key)
    x = jax.random.normal(kx, (B, C, L), jnp.float32)
    params = make_params(C, K, kp)

    fwd = jax.jit(functools.partial(residual_forward, kernel_size=K))
    out = jax.block_until_ready(fwd(x, params))

    ref = residual_reference(x, params, K)
    assert out.shape == (B, C, L), out.shape
    # slightly looser tolerance: softmax uses the EUP approx reciprocal
    assert jnp.allclose(out, ref, rtol=5e-3, atol=5e-3), float(
        jnp.max(jnp.abs(out - ref)))

    print("KERNEL_OK")
</pallas_src>

<mosaic_0001>
module attributes {stable_mosaic.version = 11 : i64} {
  func.func @_residual_rfa_kernel(%arg0: i32, %arg1: memref<1x4x130xf32, #tpu.memory_space<vmem>>, %arg2: memref<4x3xf32, #tpu.memory_space<vmem>>, %arg3: memref<4x3x3xf32, #tpu.memory_space<vmem>>, %arg4: memref<4x3xf32, #tpu.memory_space<vmem>>, %arg5: memref<4x3xf32, #tpu.memory_space<vmem>>, %arg6: memref<4x12xf32, #tpu.memory_space<vmem>>, %arg7: memref<4x1xf32, #tpu.memory_space<vmem>>, %arg8: memref<1x4x128xf32, #tpu.memory_space<vmem>>) attributes {dimension_semantics = [#tpu.dimension_semantics<parallel>], iteration_bounds = array<i64: 2>, scalar_prefetch = 0 : i64, scratch_operands = 0 : i64, tpu.core_type = #tpu.core_type<tc>, window_params = [{transform_indices = @transform_0, window_bounds = array<i64: 1, 4, 130>}, {pipeline_mode = #tpu.pipeline_mode<synchronous>, transform_indices = @transform_1, window_bounds = array<i64: 4, 3>}, {pipeline_mode = #tpu.pipeline_mode<synchronous>, transform_indices = @transform_2, window_bounds = array<i64: 4, 3, 3>}, {pipeline_mode = #tpu.pipeline_mode<synchronous>, transform_indices = @transform_3, window_bounds = array<i64: 4, 3>}, {pipeline_mode = #tpu.pipeline_mode<synchronous>, transform_indices = @transform_4, window_bounds = array<i64: 4, 3>}, {pipeline_mode = #tpu.pipeline_mode<synchronous>, transform_indices = @transform_5, window_bounds = array<i64: 4, 12>}, {pipeline_mode = #tpu.pipeline_mode<synchronous>, transform_indices = @transform_6, window_bounds = array<i64: 4, 1>}, {transform_indices = @transform_7, window_bounds = array<i64: 1, 4, 128>}]} {
    %c0 = arith.constant 0 : index
    %c0_0 = arith.constant 0 : index
    %c0_1 = arith.constant 0 : index
    %0 = vector.load %arg1[%c0, %c0_0, %c0_1] : memref<1x4x130xf32, #tpu.memory_space<vmem>>, vector<1x4x130xf32>
    %1 = vector.shape_cast %0 : vector<1x4x130xf32> to vector<4x130xf32>
    %c0_2 = arith.constant 0 : index
    %c0_3 = arith.constant 0 : index
    %2 = vector.load %arg2[%c0_2, %c0_3] : memref<4x3xf32, #tpu.memory_space<vmem>>, vector<4x3xf32>
    %c0_4 = arith.constant 0 : index
    %c0_5 = arith.constant 0 : index
    %c0_6 = arith.constant 0 : index
    %3 = vector.load %arg3[%c0_4, %c0_5, %c0_6] : memref<4x3x3xf32, #tpu.memory_space<vmem>>, vector<4x3x3xf32>
    %c0_7 = arith.constant 0 : index
    %c0_8 = arith.constant 0 : index
    %4 = vector.load %arg4[%c0_7, %c0_8] : memref<4x3xf32, #tpu.memory_space<vmem>>, vector<4x3xf32>
    %c0_9 = arith.constant 0 : index
    %c0_10 = arith.constant 0 : index
    %5 = vector.load %arg5[%c0_9, %c0_10] : memref<4x3xf32, #tpu.memory_space<vmem>>, vector<4x3xf32>
    %c0_11 = arith.constant 0 : index
    %c0_12 = arith.constant 0 : index
    %6 = vector.load %arg6[%c0_11, %c0_12] : memref<4x12xf32, #tpu.memory_space<vmem>>, vector<4x12xf32>
    %c0_13 = arith.constant 0 : index
    %c0_14 = arith.constant 0 : index
    %7 = vector.load %arg7[%c0_13, %c0_14] : memref<4x1xf32, #tpu.memory_space<vmem>>, vector<4x1xf32>
    %8 = vector.extract_strided_slice %1 {offsets = [0, 0], sizes = [4, 128], strides = [1, 1]} : vector<4x130xf32> to vector<4x128xf32>
    %9 = vector.extract_strided_slice %1 {offsets = [0, 1], sizes = [4, 128], strides = [1, 1]} : vector<4x130xf32> to vector<4x128xf32>
    %10 = arith.addf %8, %9 : vector<4x128xf32>
    %11 = vector.extract_strided_slice %1 {offsets = [0, 2], sizes = [4, 128], strides = [1, 1]} : vector<4x130xf32> to vector<4x128xf32>
    %12 = arith.addf %10, %11 : vector<4x128xf32>
    %cst = arith.constant 0.333333343 : f32
    %13 = vector.broadcast %cst : f32 to vector<4x128xf32>
    %14 = arith.mulf %12, %13 : vector<4x128xf32>
    %15 = vector.shape_cast %2 : vector<4x3xf32> to vector<4x3x1xf32>
    %16 = vector.shape_cast %14 : vector<4x128xf32> to vector<4x1x128xf32>
    %17 = vector.broadcast %15 : vector<4x3x1xf32> to vector<4x3x128xf32>
    %18 = vector.broadcast %16 : vector<4x1x128xf32> to vector<4x3x128xf32>
    %19 = arith.mulf %17, %18 : vector<4x3x128xf32>
    %cst_15 = arith.constant dense<0xFF800000> : vector<4x128xf32>
    %20 = vector.multi_reduction <maximumf>, %19, %cst_15 [1] : vector<4x3x128xf32> to vector<4x128xf32>
    %21 = vector.shape_cast %20 : vector<4x128xf32> to vector<4x1x128xf32>
    %22 = vector.broadcast %21 : vector<4x1x128xf32> to vector<4x3x128xf32>
    %23 = arith.subf %19, %22 : vector<4x3x128xf32>
    %24 = math.exp %23 : vector<4x3x128xf32>
    %cst_16 = arith.constant dense<0.000000e+00> : vector<4x128xf32>
    %25 = vector.multi_reduction <add>, %24, %cst_16 [1] : vector<4x3x128xf32> to vector<4x128xf32>
    %26 = vector.shape_cast %25 : vector<4x128xf32> to vector<4x1x128xf32>
    %27 = tpu.reciprocal %26 {approx = true} : vector<4x1x128xf32> -> vector<4x1x128xf32>
    %28 = vector.broadcast %27 : vector<4x1x128xf32> to vector<4x3x128xf32>
    %29 = arith.mulf %24, %28 : vector<4x3x128xf32>
    %30 = vector.extract_strided_slice %3 {offsets = [0, 0, 0], sizes = [4, 3, 1], strides = [1, 1, 1]} : vector<4x3x3xf32> to vector<4x3x1xf32>
    %31 = vector.shape_cast %30 : vector<4x3x1xf32> to vector<4x3xf32>
    %32 = vector.shape_cast %31 : vector<4x3xf32> to vector<4x3x1xf32>
    %33 = vector.extract_strided_slice %1 {offsets = [0, 0], sizes = [4, 128], strides = [1, 1]} : vector<4x130xf32> to vector<4x128xf32>
    %34 = vector.shape_cast %33 : vector<4x128xf32> to vector<4x1x128xf32>
    %35 = vector.broadcast %32 : vector<4x3x1xf32> to vector<4x3x128xf32>
    %36 = vector.broadcast %34 : vector<4x1x128xf32> to vector<4x3x128xf32>
    %37 = arith.mulf %35, %36 : vector<4x3x128xf32>
    %38 = vector.extract_strided_slice %3 {offsets = [0, 0, 1], sizes = [4, 3, 1], strides = [1, 1, 1]} : vector<4x3x3xf32> to vector<4x3x1xf32>
    %39 = vector.shape_cast %38 : vector<4x3x1xf32> to vector<4x3xf32>
    %40 = vector.shape_cast %39 : vector<4x3xf32> to vector<4x3x1xf32>
    %41 = vector.extract_strided_slice %1 {offsets = [0, 1], sizes = [4, 128], strides = [1, 1]} : vector<4x130xf32> to vector<4x128xf32>
    %42 = vector.shape_cast %41 : vector<4x128xf32> to vector<4x1x128xf32>
    %43 = vector.broadcast %40 : vector<4x3x1xf32> to vector<4x3x128xf32>
    %44 = vector.broadcast %42 : vector<4x1x128xf32> to vector<4x3x128xf32>
    %45 = arith.mulf %43, %44 : vector<4x3x128xf32>
    %46 = arith.addf %37, %45 : vector<4x3x128xf32>
    %47 = vector.extract_strided_slice %3 {offsets = [0, 0, 2], sizes = [4, 3, 1], strides = [1, 1, 1]} : vector<4x3x3xf32> to vector<4x3x1xf32>
    %48 = vector.shape_cast %47 : vector<4x3x1xf32> to vector<4x3xf32>
    %49 = vector.shape_cast %48 : vector<4x3xf32> to vector<4x3x1xf32>
    %50 = vector.extract_strided_slice %1 {offsets = [0, 2], sizes = [4, 128], strides = [1, 1]} : vector<4x130xf32> to vector<4x128xf32>
    %51 = vector.shape_cast %50 : vector<4x128xf32> to vector<4x1x128xf32>
    %52 = vector.broadcast %49 : vector<4x3x1xf32> to vector<4x3x128xf32>
    %53 = vector.broadcast %51 : vector<4x1x128xf32> to vector<4x3x128xf32>
    %54 = arith.mulf %52, %53 : vector<4x3x128xf32>
    %55 = arith.addf %46, %54 : vector<4x3x128xf32>
    %56 = vector.shape_cast %4 : vector<4x3xf32> to vector<4x3x1xf32>
    %57 = vector.broadcast %56 : vector<4x3x1xf32> to vector<4x3x128xf32>
    %58 = arith.mulf %55, %57 : vector<4x3x128xf32>
    %59 = vector.shape_cast %5 : vector<4x3xf32> to vector<4x3x1xf32>
    %60 = vector.broadcast %59 : vector<4x3x1xf32> to vector<4x3x128xf32>
    %61 = arith.addf %58, %60 : vector<4x3x128xf32>
    %cst_17 = arith.constant 0.000000e+00 : f32
    %62 = vector.broadcast %cst_17 : f32 to vector<4x3x128xf32>
    %63 = arith.maximumf %61, %62 : vector<4x3x128xf32>
    %64 = arith.mulf %63, %29 : vector<4x3x128xf32>
    %65 = vector.extract_strided_slice %64 {offsets = [0, 0, 0], sizes = [1, 3, 128], strides = [1, 1, 1]} : vector<4x3x128xf32> to vector<1x3x128xf32>
    %66 = vector.shape_cast %65 : vector<1x3x128xf32> to vector<3x128xf32>
    %67 = vector.extract_strided_slice %6 {offsets = [0, 0], sizes = [4, 1], strides = [1, 1]} : vector<4x12xf32> to vector<4x1xf32>
    %68 = vector.extract_strided_slice %66 {offsets = [0, 0], sizes = [1, 128], strides = [1, 1]} : vector<3x128xf32> to vector<1x128xf32>
    %69 = vector.broadcast %67 : vector<4x1xf32> to vector<4x128xf32>
    %70 = vector.broadcast %68 : vector<1x128xf32> to vector<4x128xf32>
    %71 = arith.mulf %69, %70 : vector<4x128xf32>
    %72 = vector.extract_strided_slice %6 {offsets = [0, 1], sizes = [4, 1], strides = [1, 1]} : vector<4x12xf32> to vector<4x1xf32>
    %73 = vector.extract_strided_slice %66 {offsets = [1, 0], sizes = [1, 128], strides = [1, 1]} : vector<3x128xf32> to vector<1x128xf32>
    %74 = vector.broadcast %72 : vector<4x1xf32> to vector<4x128xf32>
    %75 = vector.broadcast %73 : vector<1x128xf32> to vector<4x128xf32>
    %76 = arith.mulf %74, %75 : vector<4x128xf32>
    %77 = arith.addf %71, %76 : vector<4x128xf32>
    %78 = vector.extract_strided_slice %6 {offsets = [0, 2], sizes = [4, 1], strides = [1, 1]} : vector<4x12xf32> to vector<4x1xf32>
    %79 = vector.extract_strided_slice %66 {offsets = [2, 0], sizes = [1, 128], strides = [1, 1]} : vector<3x128xf32> to vector<1x128xf32>
    %80 = vector.broadcast %78 : vector<4x1xf32> to vector<4x128xf32>
    %81 = vector.broadcast %79 : vector<1x128xf32> to vector<4x128xf32>
    %82 = arith.mulf %80, %81 : vector<4x128xf32>
    %83 = arith.addf %77, %82 : vector<4x128xf32>
    %84 = vector.extract_strided_slice %64 {offsets = [1, 0, 0], sizes = [1, 3, 128], strides = [1, 1, 1]} : vector<4x3x128xf32> to vector<1x3x128xf32>
    %85 = vector.shape_cast %84 : vector<1x3x128xf32> to vector<3x128xf32>
    %86 = vector.extract_strided_slice %6 {offsets = [0, 3], sizes = [4, 1], strides = [1, 1]} : vector<4x12xf32> to vector<4x1xf32>
    %87 = vector.extract_strided_slice %85 {offsets = [0, 0], sizes = [1, 128], strides = [1, 1]} : vector<3x128xf32> to vector<1x128xf32>
    %88 = vector.broadcast %86 : vector<4x1xf32> to vector<4x128xf32>
    %89 = vector.broadcast %87 : vector<1x128xf32> to vector<4x128xf32>
    %90 = arith.mulf %88, %89 : vector<4x128xf32>
    %91 = arith.addf %83, %90 : vector<4x128xf32>
    %92 = vector.extract_strided_slice %6 {offsets = [0, 4], sizes = [4, 1], strides = [1, 1]} : vector<4x12xf32> to vector<4x1xf32>
    %93 = vector.extract_strided_slice %85 {offsets = [1, 0], sizes = [1, 128], strides = [1, 1]} : vector<3x128xf32> to vector<1x128xf32>
    %94 = vector.broadcast %92 : vector<4x1xf32> to vector<4x128xf32>
    %95 = vector.broadcast %93 : vector<1x128xf32> to vector<4x128xf32>
    %96 = arith.mulf %94, %95 : vector<4x128xf32>
    %97 = arith.addf %91, %96 : vector<4x128xf32>
    %98 = vector.extract_strided_slice %6 {offsets = [0, 5], sizes = [4, 1], strides = [1, 1]} : vector<4x12xf32> to vector<4x1xf32>
    %99 = vector.extract_strided_slice %85 {offsets = [2, 0], sizes = [1, 128], strides = [1, 1]} : vector<3x128xf32> to vector<1x128xf32>
    %100 = vector.broadcast %98 : vector<4x1xf32> to vector<4x128xf32>
    %101 = vector.broadcast %99 : vector<1x128xf32> to vector<4x128xf32>
    %102 = arith.mulf %100, %101 : vector<4x128xf32>
    %103 = arith.addf %97, %102 : vector<4x128xf32>
    %104 = vector.extract_strided_slice %64 {offsets = [2, 0, 0], sizes = [1, 3, 128], strides = [1, 1, 1]} : vector<4x3x128xf32> to vector<1x3x128xf32>
    %105 = vector.shape_cast %104 : vector<1x3x128xf32> to vector<3x128xf32>
    %106 = vector.extract_strided_slice %6 {offsets = [0, 6], sizes = [4, 1], strides = [1, 1]} : vector<4x12xf32> to vector<4x1xf32>
    %107 = vector.extract_strided_slice %105 {offsets = [0, 0], sizes = [1, 128], strides = [1, 1]} : vector<3x128xf32> to vector<1x128xf32>
    %108 = vector.broadcast %106 : vector<4x1xf32> to vector<4x128xf32>
    %109 = vector.broadcast %107 : vector<1x128xf32> to vector<4x128xf32>
    %110 = arith.mulf %108, %109 : vector<4x128xf32>
    %111 = arith.addf %103, %110 : vector<4x128xf32>
    %112 = vector.extract_strided_slice %6 {offsets = [0, 7], sizes = [4, 1], strides = [1, 1]} : vector<4x12xf32> to vector<4x1xf32>
    %113 = vector.extract_strided_slice %105 {offsets = [1, 0], sizes = [1, 128], strides = [1, 1]} : vector<3x128xf32> to vector<1x128xf32>
    %114 = vector.broadcast %112 : vector<4x1xf32> to vector<4x128xf32>
    %115 = vector.broadcast %113 : vector<1x128xf32> to vector<4x128xf32>
    %116 = arith.mulf %114, %115 : vector<4x128xf32>
    %117 = arith.addf %111, %116 : vector<4x128xf32>
    %118 = vector.extract_strided_slice %6 {offsets = [0, 8], sizes = [4, 1], strides = [1, 1]} : vector<4x12xf32> to vector<4x1xf32>
    %119 = vector.extract_strided_slice %105 {offsets = [2, 0], sizes = [1, 128], strides = [1, 1]} : vector<3x128xf32> to vector<1x128xf32>
    %120 = vector.broadcast %118 : vector<4x1xf32> to vector<4x128xf32>
    %121 = vector.broadcast %119 : vector<1x128xf32> to vector<4x128xf32>
    %122 = arith.mulf %120, %121 : vector<4x128xf32>
    %123 = arith.addf %117, %122 : vector<4x128xf32>
    %124 = vector.extract_strided_slice %64 {offsets = [3, 0, 0], sizes = [1, 3, 128], strides = [1, 1, 1]} : vector<4x3x128xf32> to vector<1x3x128xf32>
    %125 = vector.shape_cast %124 : vector<1x3x128xf32> to vector<3x128xf32>
    %126 = vector.extract_strided_slice %6 {offsets = [0, 9], sizes = [4, 1], strides = [1, 1]} : vector<4x12xf32> to vector<4x1xf32>
    %127 = vector.extract_strided_slice %125 {offsets = [0, 0], sizes = [1, 128], strides = [1, 1]} : vector<3x128xf32> to vector<1x128xf32>
    %128 = vector.broadcast %126 : vector<4x1xf32> to vector<4x128xf32>
    %129 = vector.broadcast %127 : vector<1x128xf32> to vector<4x128xf32>
    %130 = arith.mulf %128, %129 : vector<4x128xf32>
    %131 = arith.addf %123, %130 : vector<4x128xf32>
    %132 = vector.extract_strided_slice %6 {offsets = [0, 10], sizes = [4, 1], strides = [1, 1]} : vector<4x12xf32> to vector<4x1xf32>
    %133 = vector.extract_strided_slice %125 {offsets = [1, 0], sizes = [1, 128], strides = [1, 1]} : vector<3x128xf32> to vector<1x128xf32>
    %134 = vector.broadcast %132 : vector<4x1xf32> to vector<4x128xf32>
    %135 = vector.broadcast %133 : vector<1x128xf32> to vector<4x128xf32>
    %136 = arith.mulf %134, %135 : vector<4x128xf32>
    %137 = arith.addf %131, %136 : vector<4x128xf32>
    %138 = vector.extract_strided_slice %6 {offsets = [0, 11], sizes = [4, 1], strides = [1, 1]} : vector<4x12xf32> to vector<4x1xf32>
    %139 = vector.extract_strided_slice %125 {offsets = [2, 0], sizes = [1, 128], strides = [1, 1]} : vector<3x128xf32> to vector<1x128xf32>
    %140 = vector.broadcast %138 : vector<4x1xf32> to vector<4x128xf32>
    %141 = vector.broadcast %139 : vector<1x128xf32> to vector<4x128xf32>
    %142 = arith.mulf %140, %141 : vector<4x128xf32>
    %143 = arith.addf %137, %142 : vector<4x128xf32>
    %144 = vector.broadcast %7 : vector<4x1xf32> to vector<4x128xf32>
    %145 = arith.addf %143, %144 : vector<4x128xf32>
    %146 = vector.extract_strided_slice %1 {offsets = [0, 1], sizes = [4, 128], strides = [1, 1]} : vector<4x130xf32> to vector<4x128xf32>
    %147 = arith.addf %146, %145 : vector<4x128xf32>
    %c0_18 = arith.constant 0 : index
    %c0_19 = arith.constant 0 : index
    %c0_20 = arith.constant 0 : index
    %148 = vector.load %arg8[%c0_18, %c0_19, %c0_20] : memref<1x4x128xf32, #tpu.memory_space<vmem>>, vector<1x4x128xf32>
    %149 = vector.shape_cast %148 : vector<1x4x128xf32> to vector<4x128xf32>
    %150 = vector.shape_cast %147 : vector<4x128xf32> to vector<1x4x128xf32>
    tpu.vector_store %arg8[%c0_18, %c0_19, %c0_20], %150 {strides = array<i32>} : memref<1x4x128xf32, #tpu.memory_space<vmem>>, vector<1x4x128xf32>,
    return
  }
  func.func @transform_0(%arg0: i32) -> (i32, i32, i32) {
    %c0_i32 = arith.constant 0 : i32
    %c0_i32_0 = arith.constant 0 : i32
    %c0_i32_1 = arith.constant 0 : i32
    return %arg0, %c0_i32, %c0_i32_0 : i32, i32, i32
  }
  func.func @transform_1(%arg0: i32) -> (i32, i32) {
    %c0_i32 = arith.constant 0 : i32
    %c0_i32_0 = arith.constant 0 : i32
    %c0_i32_1 = arith.constant 0 : i32
    return %c0_i32, %c0_i32_0 : i32, i32
  }
  func.func @transform_2(%arg0: i32) -> (i32, i32, i32) {
    %c0_i32 = arith.constant 0 : i32
    %c0_i32_0 = arith.constant 0 : i32
    %c0_i32_1 = arith.constant 0 : i32
    %c0_i32_2 = arith.constant 0 : i32
    return %c0_i32, %c0_i32_0, %c0_i32_1 : i32, i32, i32
  }
  func.func @transform_3(%arg0: i32) -> (i32, i32) {
    %c0_i32 = arith.constant 0 : i32
    %c0_i32_0 = arith.constant 0 : i32
    %c0_i32_1 = arith.constant 0 : i32
    return %c0_i32, %c0_i32_0 : i32, i32
  }
  func.func @transform_4(%arg0: i32) -> (i32, i32) {
    %c0_i32 = arith.constant 0 : i32
    %c0_i32_0 = arith.constant 0 : i32
    %c0_i32_1 = arith.constant 0 : i32
    return %c0_i32, %c0_i32_0 : i32, i32
  }
  func.func @transform_5(%arg0: i32) -> (i32, i32) {
    %c0_i32 = arith.constant 0 : i32
    %c0_i32_0 = arith.constant 0 : i32
    %c0_i32_1 = arith.constant 0 : i32
    return %c0_i32, %c0_i32_0 : i32, i32
  }
  func.func @transform_6(%arg0: i32) -> (i32, i32) {
    %c0_i32 = arith.constant 0 : i32
    %c0_i32_0 = arith.constant 0 : i32
    %c0_i32_1 = arith.constant 0 : i32
    return %c0_i32, %c0_i32_0 : i32, i32
  }
  func.func @transform_7(%arg0: i32) -> (i32, i32, i32) {
    %c0_i32 = arith.constant 0 : i32
    %c0_i32_0 = arith.constant 0 : i32
    %c0_i32_1 = arith.constant 0 : i32
    return %arg0, %c0_i32, %c0_i32_0 : i32, i32, i32
  }
}

</mosaic_0001>

<bundles_post_ra>
// kernel: residual_forward.1
= control target key start
LH: loop header
LB: loop body
LE: loop exit
PB: predicated region body
PF: predicated region fallthrough
CT: control target
= control target key end

     0   :  { %12 = vsyncpa [#allocation3], 0  ;;  %s1523_s0 = inlined_call_operand.vmem [shape: f32[2,4,130], index: 0, kind: input, shape index: {}]   ;;  %s1524_s1 = inlined_call_operand.vmem [shape: f32[4,3], index: 1, kind: input, shape index: {}]   ;;  %s1525_s2 = inlined_call_operand.vmem [shape: f32[4,3,3], index: 2, kind: input, shape index: {}]   ;;  %s1526_s3 = inlined_call_operand.vmem [shape: f32[4,3], index: 3, kind: input, shape index: {}]   ;;  %s1527_s4 = inlined_call_operand.vmem [shape: f32[4,3], index: 4, kind: input, shape index: {}]   ;;  %s1528_s5 = inlined_call_operand.vmem [shape: f32[4,12], index: 5, kind: input, shape index: {}]   ;;  %s1529_s6 = inlined_call_operand.vmem [shape: f32[4,1], index: 6, kind: input, shape index: {}]   ;;  %s1530_s7 = inlined_call_operand.hbm [shape: f32[2,4,128], index: 7, kind: output, shape index: {}]  }
   0x1   :  { %14 = vsyncpa [#allocation3 + $0x1], 0  ;;  %s1176_s24 = smov 0   ;;  %s1178_s25 = smov 0  }
   0x2   :  { %s1180_s26 = smov 0   ;;  %s1182_s27 = smov 0  }
   0x3 LB: > { %s1197_s28 = sadd.s32 4294967295, %s1117_s27   ;;  %s953_s29 = sadd.s32 4294967294, %s1117_s27   ;;  %s1117_s27 = sphi %s1182_s27, %s1536_s27   ;;  %s1113_s26 = sphi %s1180_s26, %s1535_s26   ;;  %s1109_s25 = sphi %s1178_s25, %s1534_s25   ;;  %s1105_s24 = sphi %s1176_s24, %s1533_s24  }
   0x4   : > { %s1201_s30 = sadd.s32 1, %s1117_s27   ;;  %s179_s8 = sadd.s32 1, %s1113_s26 }
   0x5   : > { %s176_s9 = ssub.s32 %s1117_s27, %s1201_s30  ;;  %p189_p0 = scmp.ne.s32.totalorder %s1113_s26, %s1109_s25 }
   0x6   : > { %p177_p1 = scmp.eq.s32.totalorder %s176_s9, 0  ;;  %p190_p2 = scmp.eq.s32.totalorder %s1197_s28, 1 }
   0x7   : > { %p195_p3 = scmp.ne.s32.totalorder %s1109_s25, %s1105_s24  ;;  %p196_p4 = scmp.eq.s32.totalorder %s953_s29, 1 }
   0x8   : > { %s1212_s10 = scalar_select %p177_p1, %s1113_s26, %s179_s8  }
   0x9   : > { %p1214_p5 = por %p190_p2, %p189_p0  ;;  %p1218_p6 = por %p196_p4, %p195_p3 }
   0xa   : > { %p956_p7 = scmp.ge.s32.totalorder %s1117_s27, 1  ;;  %p240_p8 = scmp.lt.s32.totalorder %s1117_s27, 3 }
   0xc   : > { %p241_p9 = pnand %p956_p7, %p240_p8 }
   0xd   : > { %p272_p10 = scmp.lt.s32.totalorder (!%p241_p9), %s1197_s28, 1  ;;  %s1121_s20 = smov (!%p241_p9), 126  }
   0xe   : > { %244 = sbr.rel (%p241_p9) target bundleno = 577 (0x241), region = 48  ;;  %s1122_s21 = smov (!%p241_p9), 127  }
   0xf   : > { %s1134_s8 = smov (!%p241_p9), 1   ;;  %s269_s9 = sand.u32 (!%p241_p9), 1, %s1109_s25  }
  0x10   : > { %s957_s13 = sshll.u32 (!%p241_p9), %s269_s9, 2  ;;  %s961_s14 = sshll.u32 (!%p241_p9), %s1197_s28, 6 }
  0x11   : > { %s881_s22 = scalar_lea.sflag (!%p241_p9), [#allocation3], %s269_s9 }
  0x13   : > { %v279_v0 = vld [vmem:[%s1525_s2] sm:$0x7]  ;;  %v1119_v1 = vmov 2   ;;  %v1120_v2 = vmov 1   ;;  %s273_s15 = scalar_select %p272_p10, %s1197_s28, 1  ;;  %v303_v3 = vlaneseq  ;;  %v1123_v14 = vmov 0  }
  0x14   : > { %1021 = vset.pattern.permute.xlu1 %v1119_v1  ;;  %1020 = vset.pattern.permute.xlu0 %v1120_v2  ;;  %v280_v5 = vld [vmem:[%s1525_s2 + $0x4] sm:$0x7]  ;;  %v281_v7 = vld [vmem:[%s1525_s2 + $0x8] sm:$0x7]  ;;  %v278_v9 = vld [vmem:[%s1524_s1] sm:$0xf] }
  0x15   : > { %606 = vperm.xlu1 %1021, %v279_v0   ;;  %s964_s16 = sshll.u32 %s273_s15, 3  ;;  %v1244_v6 = vshrl.u32 %v303_v3, 7  ;;  %v282_v15 = vld [vmem:[%s1525_s2 + $0xc] sm:$0x7]  ;;  %v283_v18 = vld [vmem:[%s1526_s3] sm:$0xf] }
  0x16   : > { %s276_s19 = scalar_lea.vmem %s1523_s0, %s964_s16  ;;  %v1285_v22 = vld [vmem:[%s1527_s4] sm:$0xf]  ;;  %v1124_v27 = vmov 3   ;;  %v1125_v29 = vmov 6   ;;  %v1126_v31 = vmov 9   ;;  %v1127_v32 = vmov 4  }
  0x17   : > { %v1234_v4 = vld [vmem:[%s276_s19] sm:$0xff]  ;;  %v1250_v8 = vsub.s32 0, %v1244_v6  ;;  %v1258_v11 = vsub.s32 1, %v1244_v6  ;;  %v1263_v13 = vsub.s32 2, %v1244_v6  ;;  %v1272_v17 = vsub.s32 3, %v1244_v6  ;;  %s271_s15 = scalar_lea.vmem [#allocation2], %s957_s13  ;;  %s1487_s19 = scalar_lea.hbm %s1530_s7, %s961_s14 }
  0x18   : > { %288 = vrot.lane.b32.xlu0 %v1234_v4, %s1122_s21  ;;  %v1294_v25 = vld [vmem:[%s1528_s5] sm:$0xf]  ;;  %v1128_v33 = vmov 5   ;;  %v1129_v35 = vmov 7   ;;  %v1130_v36 = vmov 8   ;;  %vm291_vm0 = vcmask 1039360  }
  0x19   : > { %1022 = vset.pattern.permute.xlu1 %v1120_v2  ;;  %v306_v10 = vrot.slane %v278_v9, %v1250_v8  ;;  %v313_v12 = vrot.slane %v278_v9, %v1258_v11  ;;  %v320_v16 = vrot.slane %v278_v9, %v1263_v13  ;;  %v327_v19 = vrot.slane %v278_v9, %v1272_v17  ;;  %s894_s16 = sshll.u32 %s271_s15, 4  ;;  %s1135_s28 = smov [#allocation2]   ;;  %s895_s16 = int_to_ptr.vmem [resolvable:$true] %s894_s16 }
  0x1a   : > { %295 = vrot.lane.b32.xlu1 %v1234_v4, %s1121_s20  ;;  %v668_v20 = vrot.slane %v283_v18, %v1250_v8  ;;  %v675_v21 = vrot.slane %v283_v18, %v1258_v11  ;;  %v721_v23 = vrot.slane %v1285_v22, %v1272_v17  ;;  %v700_v24 = vrot.slane %v1285_v22, %v1250_v8  ;;  %s1057_s23 = scalar_lea.vmem %s895_s16, 64 }
  0x1b   : > { %v707_v26 = vrot.slane %v1285_v22, %v1258_v11  ;;  %v714_v28 = vrot.slane %v1285_v22, %v1263_v13  ;;  %v682_v30 = vrot.slane %v283_v18, %v1263_v13  ;;  %v689_v34 = vrot.slane %v283_v18, %v1272_v17  ;;  %p1058_p11 = scmp.ne.s32.totalorder %s895_s16, %s1057_s23 }
  0x1c   : > { %526 = vperm.xlu0 %1020, %v279_v0   ;;  %v1131_v37 = vmov 1966171168   ;;  %vm298_vm1 = vcmask 1031168   ;;  %vm380_vm2 = vcmask 1042432   ;;  %vm867_vm3 = vcmask 7168  }
  0x1d   : > { %v333_v38 = vunpack.c.l.s4 %v1131_v37  ;;  %p1059_p12 = pnand %p1058_p11, %p1214_p5 }
  0x1e   : > { %530 = vperm.xlu1 %1022, %v280_v5  }
  0x1f   : > { %v334_v39 = vunpack.c.0.s8 %v333_v38  ;;  %p1060_p13 = pneg %p1059_p12 }
  0x20   : > { %1023 = vset.pattern.permute.xlu0 %v1119_v1 }
  0x21   : > { %610 = vperm.xlu0 %1023, %v280_v5   ;;  %v1313_v40 = vsub.s32 %v334_v39, %v1244_v6 }
  0x22   : > { %534 = vperm.xlu1 %1022, %v281_v7  }
  0x23   : > { %v463_v42 = vrot.slane %v1234_v4, %v1313_v40 }
  0x25   : > { %308 = vbcast.lane.b32.xlu0 %v306_v10, 256  ;;  %v471_v45 = vrot.slane %v463_v42, %v1313_v40  ;;  %v464_v48 = vcombine.high %v463_v42, %v463_v42 }
  0x26   : > { %1024 = vset.pattern.permute.xlu1 %v1119_v1  ;;  %1027 = vset.pattern.permute.xlu0 %v1123_v14 }
  0x27   : > { %614 = vperm.xlu1 %1024, %v281_v7   ;;  %v1321_v51 = vrot.slane %v471_v45, %v1250_v8  ;;  %v544_v52 = vrot.slane %v471_v45, %v1258_v11  ;;  %v478_v55 = vrot.slane %v464_v48, %v1313_v40  ;;  %v479_v3 = vcombine.high %v471_v45, %v471_v45 }
  0x29   : > { %315 = vbcast.lane.b32.xlu0 %v313_v12, 256  ;;  %v1328_v60 = vrot.slane %v478_v55, %v1250_v8  ;;  %v548_v61 = vrot.slane %v478_v55, %v1258_v11  ;;  %v1341_v9 = vrot.slane %v479_v3, %v1250_v8  ;;  %v552_v10 = vrot.slane %v479_v3, %v1258_v11 }
  0x2b   : > { %1025 = vset.pattern.permute.xlu1 %v1120_v2 }
  0x2c   : > { %538 = vperm.xlu1 %1025, %v282_v15  }
  0x2d   : > { %322 = vbcast.lane.b32.xlu0 %v320_v16, 256  ;;  %v480_v16 = vcombine.high %v478_v55, %v478_v55 }
  0x30   : > { %1026 = vset.pattern.permute.xlu1 %v1119_v1 }
  0x31   : > { %618 = vperm.xlu1 %1026, %v282_v15   ;;  %483 = vperm.xlu0 %1027, %v279_v0  }
  0x35   : > { %329 = vbcast.lane.b32.xlu1 %v327_v19, 256  ;;  %670 = vbcast.lane.b32.xlu0 %v668_v20, 256 }
  0x36   : > { %1028 = vset.pattern.permute.xlu1 %v1123_v14 }
  0x39   : > { %488 = vperm.xlu1 %1028, %v280_v5   ;;  %677 = vbcast.lane.b32.xlu0 %v675_v21, 256  ;;  %v1349_v21 = vrot.slane %v480_v16, %v1250_v8 }
  0x3d   : > { %493 = vperm.xlu1 %1028, %v281_v7   ;;  %739 = vperm.xlu0 %1027, %v1294_v25  }
  0x41   : > { %702 = vbcast.lane.b32.xlu1 %v700_v24, 256  ;;  %709 = vbcast.lane.b32.xlu0 %v707_v26, 256  ;;  %v556_v24 = vrot.slane %v480_v16, %v1258_v11 }
  0x42   : > { %1031 = vset.pattern.permute.xlu0 %v1124_v27 }
  0x45   : > { %498 = vperm.xlu1 %1028, %v282_v15   ;;  %768 = vperm.xlu0 %1031, %v1294_v25  }
  0x49   : > { %1029 = vset.pattern.permute.xlu1 %v1120_v2  ;;  %716 = vbcast.lane.b32.xlu0 %v714_v28, 256 }
  0x4a   : > { %748 = vperm.xlu1 %1029, %v1294_v25   ;;  %1034 = vset.pattern.permute.xlu0 %v1125_v29 }
  0x4d   : > { %798 = vperm.xlu0 %1034, %v1294_v25  }
  0x4e   : > { %1030 = vset.pattern.permute.xlu1 %v1119_v1 }
  0x4f   : > { %758 = vperm.xlu1 %1030, %v1294_v25  }
  0x51   : > { %1037 = vset.pattern.permute.xlu0 %v1126_v31 }
  0x53   : > { %684 = vbcast.lane.b32.xlu1 %v682_v30, 256 }
  0x54   : > { %1032 = vset.pattern.permute.xlu1 %v1127_v32 }
  0x57   : > { %778 = vperm.xlu1 %1032, %v1294_v25  }
  0x5b   : > { %1033 = vset.pattern.permute.xlu1 %v1128_v33 }
  0x5c   : > { %788 = vperm.xlu1 %1033, %v1294_v25  }
  0x60   : > { %691 = vbcast.lane.b32.xlu1 %v689_v34, 256 }
  0x61   : > { %1035 = vset.pattern.permute.xlu1 %v1129_v35 }
  0x64   : > { %808 = vperm.xlu1 %1035, %v1294_v25  }
  0x68   : > { %1036 = vset.pattern.permute.xlu1 %v1130_v36 }
  0x8a   : > { %v289_v41 = vpop.permute.xlu0 %288 }
  0x8b   : > { %v290_v43 = vrot.slane %v289_v41, 4 }
  0x8d   : > { %v292_v46 = vsel %vm291_vm0, %v289_v41, %v290_v43 }
  0x8e   : > { %v294_v50 = vadd.f32 %v292_v46, %v1234_v4  ;;  %v1132_v46 = vmov 10  }
  0x90   : > { %v607_v44 = vpop.permute.xlu1 %606 }
  0x91   : > { %v621_v62 = vmul.f32 %v607_v44, %v1321_v51  ;;  %v622_v63 = vmul.f32 %v607_v44, %v544_v52 }
  0x94   : > { %v296_v47 = vpop.permute.xlu1 %295 }
  0x95   : > { %v297_v49 = vrot.slane %v296_v47, 4 }
  0x97   : > { %v299_v53 = vsel %vm298_vm1, %v296_v47, %v297_v49  ;;  %v527_v56 = vpop.permute.xlu0 %526  ;;  %v1133_v49 = vmov 11  }
  0x98   : > { %v301_v54 = vadd.f32 %v299_v53, %v294_v50  ;;  %v561_v57 = vmul.f32 %v527_v56, %v1321_v51  ;;  %v562_v58 = vmul.f32 %v544_v52, %v527_v56 }
  0x99   : > { %v531_v59 = vpop.permute.xlu1 %530 }
  0x9a   : > { %579 = vrot.lane.b32.xlu0 %v562_v58, %s1122_s21  ;;  %577 = vrot.lane.b32.xlu1 %v561_v57, %s1122_s21  ;;  %v563_v0 = vmul.f32 %v531_v59, %v1328_v60  ;;  %v564_v1 = vmul.f32 %v548_v61, %v531_v59  ;;  %v302_v15 = vmul.f32 0.33333334, %v301_v54 }
  0x9c   : > { %v611_v5 = vpop.permute.xlu0 %610  ;;  %v338_v20 = vrot.slane %v302_v15, %v1313_v40 }
  0x9d   : > { %v535_v2 = vpop.permute.xlu1 %534  ;;  %v623_v6 = vmul.f32 %v611_v5, %v1328_v60  ;;  %v624_v7 = vmul.f32 %v611_v5, %v548_v61 }
  0x9e   : > { %639 = vrot.lane.b32.xlu0 %v622_v63, %s1121_s20  ;;  %637 = vrot.lane.b32.xlu1 %v621_v62, %s1121_s20  ;;  %v565_v18 = vmul.f32 %v535_v2, %v1341_v9  ;;  %v566_v19 = vmul.f32 %v552_v10, %v535_v2  ;;  %v346_v29 = vrot.slane %v338_v20, %v1313_v40 }
  0x9f   : > { %v339_v37 = vcombine.high %v338_v20, %v338_v20 }
  0xa0   : > { %v359_v33 = vrot.slane %v346_v29, %v1250_v8  ;;  %v309_v36 = vpop.permute.xlu0 %308  ;;  %v354_v47 = vcombine.high %v346_v29, %v346_v29 }
  0xa1   : > { %v353_v39 = vrot.slane %v339_v37, %v1313_v40  ;;  %v286_v40 = vld [vmem:[%s1529_s6] sm:$0xf] }
  0xa2   : > { %583 = vrot.lane.b32.xlu1 %v564_v1, %s1122_s21  ;;  %581 = vrot.lane.b32.xlu0 %v563_v0, %s1122_s21  ;;  %v615_v12 = vpop.permute.xlu1 %614  ;;  %v376_v38 = vmul.f32 %v359_v33, %v309_v36  ;;  %v367_v48 = vrot.slane %v354_v47, %v1250_v8 }
  0xa3   : > { %v625_v27 = vmul.f32 %v615_v12, %v1341_v9  ;;  %v626_v28 = vmul.f32 %v615_v12, %v552_v10  ;;  %v363_v43 = vrot.slane %v353_v39, %v1250_v8  ;;  %v355_v54 = vcombine.high %v353_v39, %v353_v39 }
  0xa4   : > { %v381_v41 = vsel %vm380_vm2, %v376_v38, -inf  ;;  %v316_v42 = vpop.permute.xlu0 %315 }
  0xa5   : > { %v382_v44 = vrot.slane %v381_v41, 4  ;;  %v377_v45 = vmul.f32 %v363_v43, %v316_v42  ;;  %v371_v59 = vrot.slane %v355_v54, %v1250_v8 }
  0xa6   : > { %641 = vrot.lane.b32.xlu1 %v623_v6, %s1121_s20  ;;  %643 = vrot.lane.b32.xlu0 %v624_v7, %s1121_s20 }
  0xa7   : > { %v539_v26 = vpop.permute.xlu1 %538  ;;  %v383_v17 = vmax.f32 %v381_v41, %v382_v44  ;;  %v388_v22 = vsel %vm380_vm2, %v377_v45, -inf }
  0xa8   : > { %v567_v30 = vmul.f32 %v539_v26, %v1349_v21  ;;  %v568_v31 = vmul.f32 %v556_v24, %v539_v26  ;;  %v389_v52 = vrot.slane %v388_v22, 4 }
  0xa9   : > { %v384_v50 = vrot.slane %v383_v17, 2 }
  0xaa   : > { %587 = vrot.lane.b32.xlu1 %v566_v19, %s1122_s21  ;;  %585 = vrot.lane.b32.xlu0 %v565_v18, %s1122_s21  ;;  %v390_v56 = vmax.f32 %v388_v22, %v389_v52 }
  0xab   : > { %v385_v55 = vmax.f32 %v383_v17, %v384_v50 }
  0xac   : > { %v619_v32 = vpop.permute.xlu1 %618  ;;  %v391_v62 = vrot.slane %v390_v56, 2 }
  0xad   : > { %v627_v34 = vmul.f32 %v619_v32, %v1349_v21  ;;  %v628_v35 = vmul.f32 %v619_v32, %v556_v24 }
  0xae   : > { %645 = vrot.lane.b32.xlu1 %v625_v27, %s1121_s20  ;;  %647 = vrot.lane.b32.xlu0 %v626_v28, %s1121_s20 }
  0xb0   : > { %v330_v58 = vpop.permute.xlu1 %329 }
  0xb1   : > { %v379_v63 = vmul.f32 %v371_v59, %v330_v58 }
  0xb2   : > { %591 = vrot.lane.b32.xlu0 %v568_v31, %s1122_s21  ;;  %589 = vrot.lane.b32.xlu1 %v567_v30, %s1122_s21 }
  0xb3   : > { %v402_v3 = vsel %vm380_vm2, %v379_v63, -inf }
  0xb4   : > { %v1383_v0 = vpop.permute.xlu1 %488  ;;  %v403_v6 = vrot.slane %v402_v3, 4 }
  0xb6   : > { %651 = vrot.lane.b32.xlu0 %v628_v35, %s1121_s20  ;;  %649 = vrot.lane.b32.xlu1 %v627_v34, %s1121_s20  ;;  %v404_v16 = vmax.f32 %v402_v3, %v403_v6 }
  0xb8   : > { %v1386_v7 = vpop.permute.xlu1 %493  ;;  %v405_v26 = vrot.slane %v404_v16, 2 }
  0xba   : > { %723 = vbcast.lane.b32.xlu0 %v721_v23, 256  ;;  %818 = vperm.xlu1 %1036, %v1294_v25   ;;  %v323_v23 = vpop.permute.xlu0 %322  ;;  %v406_v29 = vmax.f32 %v404_v16, %v405_v26 }
  0xbb   : > { %v378_v53 = vmul.f32 %v367_v48, %v323_v23 }
  0xbc   : > { %v1388_v20 = vpop.permute.xlu1 %702  ;;  %v407_v34 = vrot.slane %v406_v29, 1 }
  0xbd   : > { %v395_v57 = vsel %vm380_vm2, %v378_v53, -inf }
  0xbe   : > { %828 = vperm.xlu0 %1037, %v1294_v25   ;;  %1038 = vset.pattern.permute.xlu1 %v1132_v46  ;;  %v396_v61 = vrot.slane %v395_v57, 4  ;;  %v484_v31 = vpop.permute.xlu0 %483 }
  0xbf   : > { %838 = vperm.xlu1 %1038, %v1294_v25  }
  0xc0   : > { %v397_v1 = vmax.f32 %v395_v57, %v396_v61  ;;  %v1390_v30 = vpop.permute.xlu1 %498 }
  0xc2   : > { %1040 = vset.pattern.permute.xlu0 %v1123_v14  ;;  %v386_v14 = vrot.slane %v385_v55, 1  ;;  %v398_v5 = vrot.slane %v397_v1, 2  ;;  %v671_v36 = vpop.permute.xlu0 %670 }
  0xc3   : > { %1039 = vset.pattern.permute.xlu1 %v1133_v49  ;;  %859 = vperm.xlu0 %1040, %v286_v40  }
  0xc4   : > { %848 = vperm.xlu1 %1039, %v1294_v25   ;;  %v387_v2 = vmax.f32 %v385_v55, %v386_v14  ;;  %v392_v25 = vmax.f32 %v390_v56, %v391_v62  ;;  %v399_v15 = vmax.f32 %v397_v1, %v398_v5 }
  0xc5   : > { %v1392_v35 = vpop.permute.xlu1 %748 }
  0xc6   : > { %v409_v10 = vsub.f32 %v376_v38, %v387_v2  ;;  %v393_v12 = vrot.slane %v392_v25, 1  ;;  %v400_v24 = vrot.slane %v399_v15, 1  ;;  %v408_v38 = vmax.f32 %v406_v29, %v407_v34  ;;  %v1398_v43 = vpop.permute.xlu0 %677 }
  0xc7   : > { %v521_v29 = vmul.f32 %v1321_v51, %v484_v31  ;;  %v522_v51 = vmul.f32 %v1328_v60, %v1383_v0 }
  0xc8   : > { %v413_v18 = vmul.f32 1.442695, %v409_v10  ;;  %v394_v19 = vmax.f32 %v392_v25, %v393_v12  ;;  %v401_v28 = vmax.f32 %v399_v15, %v400_v24  ;;  %v412_v42 = vsub.f32 %v379_v63, %v408_v38 }
  0xca   : > { %1041 = vpow2.f32 %v413_v18  ;;  %v410_v27 = vsub.f32 %v377_v45, %v394_v19  ;;  %v411_v33 = vsub.f32 %v378_v53, %v401_v28  ;;  %v1396_v41 = vpop.permute.xlu1 %758  ;;  %v419_v46 = vmul.f32 1.442695, %v412_v42  ;;  %v1406_v17 = vpop.permute.xlu0 %739 }
  0xcc   : > { %v415_v32 = vmul.f32 1.442695, %v410_v27  ;;  %v417_v37 = vmul.f32 1.442695, %v411_v33 }
  0xce   : > { %1043 = vpow2.f32 %v415_v32  ;;  %v1402_v47 = vpop.permute.xlu1 %684  ;;  %v1412_v49 = vpop.permute.xlu0 %709 }
  0xcf   : > { %1045 = vpow2.f32 %v417_v37 }
  0xd0   : > { %1047 = vpow2.f32 %v419_v46 }
  0xd2   : > { %v1410_v48 = vpop.permute.xlu1 %778  ;;  %v1420_v58 = vpop.permute.xlu0 %768 }
  0xd6   : > { %v1426_v1 = vpop.permute.xlu0 %716 }
  0xd7   : > { %v1394_v39 = vpop.eup %1041  ;;  %v1418_v57 = vpop.permute.xlu1 %788 }
  0xd8   : > { %v421_v44 = vsel %vm380_vm2, %v1394_v39, 0.0 }
  0xd9   : > { %v422_v45 = vrot.slane %v421_v44, 4 }
  0xda   : > { %v1432_v10 = vpop.permute.xlu0 %798 }
  0xdb   : > { %v1404_v40 = vpop.eup %1043  ;;  %v423_v22 = vadd.f32 %v422_v45, %v421_v44  ;;  %v1424_v63 = vpop.permute.xlu1 %691 }
  0xdc   : > { %v428_v23 = vsel %vm380_vm2, %v1404_v40, 0.0  ;;  %v1414_v53 = vpop.eup %1045 }
  0xdd   : > { %v424_v50 = vrot.slane %v423_v22, 2  ;;  %v429_v52 = vrot.slane %v428_v23, 4  ;;  %v435_v56 = vsel %vm380_vm2, %v1414_v53, 0.0  ;;  %v1422_v62 = vpop.eup %1047 }
  0xde   : > { %v436_v59 = vrot.slane %v435_v56, 4  ;;  %v442_v5 = vsel %vm380_vm2, %v1422_v62, 0.0 }
  0xdf   : > { %v425_v54 = vadd.f32 %v424_v50, %v423_v22  ;;  %v430_v55 = vadd.f32 %v429_v52, %v428_v23  ;;  %v1430_v6 = vpop.permute.xlu1 %808  ;;  %v443_v15 = vrot.slane %v442_v5, 4 }
  0xe0   : > { %v437_v2 = vadd.f32 %v436_v59, %v435_v56 }
  0xe1   : > { %v426_v61 = vrot.slane %v425_v54, 1  ;;  %v431_v14 = vrot.slane %v430_v55, 2  ;;  %v444_v19 = vadd.f32 %v443_v15, %v442_v5 }
  0xe2   : > { %v438_v12 = vrot.slane %v437_v2, 2 }
  0xe3   : > { %v427_v25 = vadd.f32 %v426_v61, %v425_v54  ;;  %v432_v3 = vadd.f32 %v431_v14, %v430_v55  ;;  %v445_v33 = vrot.slane %v444_v19, 2 }
  0xe4   : > { %v439_v18 = vadd.f32 %v438_v12, %v437_v2 }
  0xe5   : > { %1049 = vrcp.f32 %v427_v25  ;;  %v433_v16 = vrot.slane %v432_v3, 1  ;;  %v446_v46 = vadd.f32 %v445_v33, %v444_v19 }
  0xe6   : > { %v440_v32 = vrot.slane %v439_v18, 1 }
  0xe7   : > { %v434_v24 = vadd.f32 %v433_v16, %v432_v3  ;;  %v447_v55 = vrot.slane %v446_v46, 1 }
  0xe8   : > { %v441_v45 = vadd.f32 %v440_v32, %v439_v18  ;;  %v523_v18 = vmul.f32 %v1341_v9, %v1386_v7 }
  0xe9   : > { %1051 = vrcp.f32 %v434_v24  ;;  %v448_v5 = vadd.f32 %v447_v55, %v446_v46 }
  0xea   : > { %1053 = vrcp.f32 %v441_v45  ;;  %v524_v45 = vmul.f32 %v1349_v21, %v1390_v30 }
  0xeb   : > { %1055 = vrcp.f32 %v448_v5 }
  0xf2   : > { %v1050_v52 = vpop.eup %1049 }
  0xf3   : > { %v453_v56 = vmul.f32 %v1050_v52, %v1394_v39 }
  0xf6   : > { %v1052_v16 = vpop.eup %1051 }
  0xf7   : > { %v1054_v7 = vpop.eup %1053 }
  0xf8   : > { %v455_v52 = vmul.f32 %v1054_v7, %v1414_v53 }
 0x10c   : > { %v580_v26 = vpop.permute.xlu0 %579  ;;  %v578_v27 = vpop.permute.xlu1 %577 }
 0x10d   : > { %v593_v28 = vsel %vm291_vm0, %v578_v27, %v580_v26 }
 0x10e   : > { %v601_v34 = vadd.f32 %v593_v28, %v521_v29  ;;  %v454_v28 = vmul.f32 %v1052_v16, %v1404_v40 }
 0x110   : > { %v640_v37 = vpop.permute.xlu0 %639  ;;  %v638_v38 = vpop.permute.xlu1 %637 }
 0x111   : > { %v653_v42 = vsel %vm298_vm1, %v638_v38, %v640_v37 }
 0x112   : > { %v661_v44 = vadd.f32 %v653_v42, %v601_v34 }
 0x114   : > { %v693_v22 = vmul.f32 %v671_v36, %v661_v44  ;;  %v584_v23 = vpop.permute.xlu1 %583  ;;  %v582_v50 = vpop.permute.xlu0 %581 }
 0x115   : > { %v594_v54 = vsel %vm291_vm0, %v582_v50, %v584_v23 }
 0x116   : > { %v725_v31 = vadd.f32 %v1388_v20, %v693_v22  ;;  %v602_v61 = vadd.f32 %v594_v54, %v522_v51 }
 0x118   : > { %v729_v59 = vmax.f32 %v725_v31, 0.0  ;;  %v642_v14 = vpop.permute.xlu1 %641  ;;  %v644_v2 = vpop.permute.xlu0 %643 }
 0x119   : > { %v654_v36 = vsel %vm298_vm1, %v642_v14, %v644_v2  ;;  %v1056_v14 = vpop.eup %1055 }
 0x11a   : > { %v733_v25 = vmul.f32 %v729_v59, %v453_v56  ;;  %v662_v3 = vadd.f32 %v654_v36, %v602_v61 }
 0x11c   : > { %v745_v12 = vrot.slane %v733_v25, %v1250_v8  ;;  %v754_v15 = vrot.slane %v733_v25, %v1258_v11  ;;  %v694_v60 = vmul.f32 %v1398_v43, %v662_v3  ;;  %v588_v0 = vpop.permute.xlu1 %587  ;;  %v586_v20 = vpop.permute.xlu0 %585  ;;  %v764_v27 = vrot.slane %v733_v25, %v1263_v13 }
 0x11d   : > { %v595_v39 = vsel %vm291_vm0, %v586_v20, %v588_v0 }
 0x11e   : > { %v746_v19 = vmul.f32 %v745_v12, %v1406_v17  ;;  %v755_v24 = vmul.f32 %v754_v15, %v1392_v35  ;;  %v726_v26 = vadd.f32 %v1412_v49, %v694_v60  ;;  %v603_v29 = vadd.f32 %v595_v39, %v523_v18 }
 0x11f   : > { %v765_v17 = vmul.f32 %v764_v27, %v1396_v41 }
 0x120   : > { %v730_v43 = vmax.f32 %v726_v26, 0.0  ;;  %v646_v32 = vpop.permute.xlu1 %645  ;;  %v648_v33 = vpop.permute.xlu0 %647  ;;  %v756_v9 = vadd.f32 %v755_v24, %v746_v19 }
 0x121   : > { %v655_v34 = vsel %vm298_vm1, %v646_v32, %v648_v33 }
 0x122   : > { %v734_v37 = vmul.f32 %v730_v43, %v454_v28  ;;  %v663_v38 = vadd.f32 %v655_v34, %v603_v29  ;;  %v766_v23 = vadd.f32 %v765_v17, %v756_v9 }
 0x124   : > { %v774_v35 = vrot.slane %v734_v37, %v1250_v8  ;;  %v784_v49 = vrot.slane %v734_v37, %v1258_v11  ;;  %v695_v42 = vmul.f32 %v1402_v47, %v663_v38  ;;  %v592_v44 = vpop.permute.xlu0 %591  ;;  %v590_v40 = vpop.permute.xlu1 %589  ;;  %v794_v41 = vrot.slane %v734_v37, %v1263_v13 }
 0x125   : > { %v596_v46 = vsel %vm291_vm0, %v590_v40, %v592_v44 }
 0x126   : > { %v727_v22 = vadd.f32 %v1426_v1, %v695_v42  ;;  %v775_v50 = vmul.f32 %v774_v35, %v1420_v58  ;;  %v604_v51 = vadd.f32 %v596_v46, %v524_v45  ;;  %v785_v56 = vmul.f32 %v784_v49, %v1410_v48 }
 0x127   : > { %v795_v1 = vmul.f32 %v794_v41, %v1418_v57  ;;  %v456_v48 = vmul.f32 %v1056_v14, %v1422_v62 }
 0x128   : > { %v731_v54 = vmax.f32 %v727_v22, 0.0  ;;  %v652_v31 = vpop.permute.xlu0 %651  ;;  %v650_v47 = vpop.permute.xlu1 %649  ;;  %v776_v55 = vadd.f32 %v775_v50, %v766_v23 }
 0x129   : > { %v656_v21 = vsel %vm298_vm1, %v650_v47, %v652_v31 }
 0x12a   : > { %v664_v30 = vadd.f32 %v656_v21, %v604_v51  ;;  %v735_v59 = vmul.f32 %v731_v54, %v455_v52  ;;  %v786_v61 = vadd.f32 %v785_v56, %v776_v55 }
 0x12c   : > { %v724_v58 = vpop.permute.xlu0 %723  ;;  %v696_v2 = vmul.f32 %v1424_v63, %v664_v30  ;;  %v796_v36 = vadd.f32 %v795_v1, %v786_v61  ;;  %v804_v53 = vrot.slane %v735_v59, %v1250_v8  ;;  %v814_v25 = vrot.slane %v735_v59, %v1258_v11 }
 0x12d   : > { %v824_v20 = vrot.slane %v735_v59, %v1263_v13 }
 0x12e   : > { %v728_v3 = vadd.f32 %v724_v58, %v696_v2  ;;  %v805_v5 = vmul.f32 %v804_v53, %v1432_v10  ;;  %v815_v60 = vmul.f32 %v814_v25, %v1430_v6 }
 0x130   : > { %v732_v12 = vmax.f32 %v728_v3, 0.0  ;;  %v806_v15 = vadd.f32 %v805_v5, %v796_v36 }
 0x132   : > { %v736_v0 = vmul.f32 %v732_v12, %v456_v48  ;;  %v816_v57 = vadd.f32 %v815_v60, %v806_v15 }
 0x134   : > { %v834_v18 = vrot.slane %v736_v0, %v1250_v8  ;;  %v844_v24 = vrot.slane %v736_v0, %v1258_v11  ;;  %v854_v43 = vrot.slane %v736_v0, %v1263_v13 }
 0x135   : > { %v819_v16 = vpop.permute.xlu1 %818 }
 0x136   : > { %v825_v63 = vmul.f32 %v824_v20, %v819_v16 }
 0x138   : > { %v826_v39 = vadd.f32 %v825_v63, %v816_v57 }
 0x139   : > { %v829_v19 = vpop.permute.xlu0 %828 }
 0x13a   : > { %v835_v26 = vmul.f32 %v834_v18, %v829_v19  ;;  %v839_v10 = vpop.permute.xlu1 %838 }
 0x13b   : > { %v845_v27 = vmul.f32 %v844_v24, %v839_v10 }
 0x13c   : > { %v836_v62 = vadd.f32 %v835_v26, %v826_v39 }
 0x13e   : > { %v846_v28 = vadd.f32 %v845_v27, %v836_v62  ;;  %v860_v32 = vpop.permute.xlu0 %859 }
 0x13f   : > { %v849_v6 = vpop.permute.xlu1 %848 }
 0x140   : > { %v855_v29 = vmul.f32 %v854_v43, %v849_v6 }
 0x142   : > { %v856_v33 = vadd.f32 %v855_v29, %v846_v28 }
 0x144   : > { %v862_v34 = vadd.f32 %v860_v32, %v856_v33 }
 0x146   : > { %864 = vrot.lane.b32.xlu1 %v862_v34, %s1134_s8 }
 0x1b8   : > { %v865_v8 = vpop.permute.xlu1 %864 }
 0x1b9   : > { %v866_v37 = vrot.slane %v865_v8, 4 }
 0x1bb   : > { %v868_v11 = vsel %vm867_vm3, %v866_v37, %v865_v8 }
 0x1bc   : > { %v870_v38 = vadd.f32 %v868_v11, %v1234_v4 }
 0x1be   : > { %873 = vrot.lane.b32.xlu1 %v870_v38, %s1122_s21  ;;  %v872_v9 = vcombine.high %v870_v38, %v870_v38 }
 0x1c0   : > { %875 = vrot.lane.b32.xlu0 %v872_v9, %s1122_s21  ;;  %s1061_s21 = sshll.u32 %s1135_s28, 4  ;;  %s1062_s21 = int_to_ptr.vmem [resolvable:$false] %s1061_s21 }
 0x1c1   : > { %s1063_s20 = scalar_lea.vmem %s1062_s21, 128  ;;  %p1064_p0 = scmp.lt.s32.totalorder %s895_s16, %s1062_s21 }
 0x1c2   : > { %p1065_p1 = scmp.lt.s32.totalorder %s1063_s20, %s1057_s23 }
 0x1c4   : > { %p1066_p2 = por %p1065_p1, %p1064_p0 }
 0x1c6   : > { %p1067_p3 = pnand %p1066_p2, %p1060_p13 }
 0x230   : > { %v874_v13 = vpop.permute.xlu1 %873 }
 0x232   : > { %v876_v7 = vpop.permute.xlu0 %875 }
 0x233   : > { %v877_v4 = vsel %vm291_vm0, %v874_v13, %v876_v7 }
 0x234   : > { %879 = vst [vmem:[%s271_s15] sm:$0xf] %v877_v4 }
 0x235   : > { %1070 = shalt.err (!%p1067_p3)
}
 0x236   : > { %s1071_s29 = scalar_lea.hbm %s1487_s19, 64  ;;  %s1075_s13 = scalar_lea.hbm %s1530_s7, 128 }
 0x237   : > { %p1072_p4 = scmp.ne.s32.totalorder %s1487_s19, %s1071_s29  ;;  %p1076_p9 = scmp.lt.s32.totalorder %s1487_s19, %s1530_s7 }
 0x238   : > { %p1077_p10 = scmp.lt.s32.totalorder %s1075_s13, %s1071_s29 }
 0x239   : > { %p1073_p7 = pnand %p1072_p4, %p1214_p5 }
 0x23a   : > { %p1078_p11 = por %p1077_p10, %p1076_p9 }
 0x23b   : > { %p1074_p8 = pneg %p1073_p7 }
 0x23d   : > { %p1079_p12 = pnand %p1078_p11, %p1074_p8 }
 0x23f   : > { %1082 = shalt.err (!%p1079_p12)
}
 0x240   : > { %965 = dma.vmem_to_hbm [thread:$0]  (%p1214_p5), %s895_s16, 64, %s1487_s19, %s881_s22  }
 0x241 PF: > { %p971_p13 = scmp.ge.s32.totalorder %s1117_s27, 2  ;;  %s906_s17 = sand.u32 1, %s1105_s24  }
 0x242   : > { %s907_s18 = scalar_lea.sflag [#allocation3], %s906_s17 }
 0x243   : > { %p968_p0 = pnand %p971_p13, %p1218_p6 }
 0x245   : > { %p969_p1 = pneg %p968_p0 }
 0x247   : > { %1100 = dma.done.wait (%p969_p1), %s907_s18, 64  }
 0x248   : > { %1102 = vsyncadd (%p969_p1), %s907_s18, 4294967232  ;;  %p17_p2 = scmp.ge.s32.totalorder %s1201_s30, 4   ;;  %s1533_s24 = smov %s1109_s25 }
 0x249   : > { %s1534_s25 = smov %s1113_s26  ;;  %s1535_s26 = smov %s1212_s10 }
 0x24a   : > { %s1536_s27 = smov %s1201_s30  ;;  %19 = sbr.rel (!%p17_p2) target bundleno = 3 (0x3), region = 83 }
 0x24f   :  { %912 = vsyncpa [#allocation3], 1 }
 0x250   :  { %914 = vsyncpa [#allocation3 + $0x1], 1 }

</bundles_post_ra>
